<compile_context>
chip_gen: v5e
topology: v5e:2x2
jax: 0.10.0
libtpu: 0.0.40
codegen_flags: <defaults>
</compile_context>

<pallas_src>
import functools

import jax
import jax.numpy as jnp
from jax.experimental import pallas as pl
from jax.experimental.pallas import tpu as pltpu

_LANE = 128
_SUBLANE = 8
_MIN_SPLIT_BYTES = 1 << 20  # only force a >=2-step grid when each half >= 1 MiB


def _quant_hardshrink_kernel(scales_ref, x_ref, o_ref, *, lambd, qmin, qmax):
    # scales_ref: SMEM f32[2] -> [scale, 1/scale]; x_ref/o_ref: VMEM (bm, 128).
    x = x_ref[...]
    # hardshrink in the native dtype (pure VPU abs/cmp/select; no upcast).
    y = jnp.where(jnp.abs(x) > lambd, x, jnp.zeros_like(x))
    # signed-int fake-quant: upcast only for the scale/round/clip step so the
    # rounding is exact; multiply by the precomputed reciprocal (no EUP/div).
    q = jnp.clip(jnp.round(y.astype(jnp.float32) * scales_ref[1]), qmin, qmax)
    o_ref[...] = (q * scales_ref[0]).astype(o_ref.dtype)


def _jnp_quant_hardshrink(x, scales, *, lambd, qmin, qmax):
    """Plain-jnp path for tiny ragged tails (and the reference)."""
    y = jnp.where(jnp.abs(x) > lambd, x, jnp.zeros_like(x))
    q = jnp.clip(jnp.round(y.astype(jnp.float32) * scales[1]), qmin, qmax)
    return (q * scales[0]).astype(x.dtype)


def _run_slab(x2, scales, *, lambd, qmin, qmax, block_rows, donate):
    """Run the kernel on a lane-dense (rows, 128) slab."""
    rows = x2.shape[0]
    itemsize = jnp.dtype(x2.dtype).itemsize
    row_bytes = _LANE * itemsize

    if block_rows is None:
        # Target ~2 MiB per input buffer: f32 -> 4096 rows, bf16 -> 8192 rows.
        block_rows = max(_SUBLANE, (2 << 20) // row_bytes)

    bm = min(int(block_rows), pl.cdiv(rows, _SUBLANE) * _SUBLANE)
    # Split into >=2 grid steps (v7x megacore sharding via the "parallel"
    # axis) only when each half carries >= ~1 MiB; otherwise the split is
    # pure per-step overhead on single-TC v5e/v6e and on small activations.
    if rows * row_bytes >= 2 * _MIN_SPLIT_BYTES:
        half_rows = pl.cdiv(pl.cdiv(rows, 2), _SUBLANE) * _SUBLANE
        bm = min(bm, half_rows)
    bm = max(_SUBLANE, bm)
    grid = (pl.cdiv(rows, bm),)  # Pallas masks the partial last block

    kernel = functools.partial(
        _quant_hardshrink_kernel, lambd=float(lambd), qmin=qmin, qmax=qmax)

    n = rows * _LANE
    cost = pl.CostEstimate(
        flops=8 * n, transcendentals=0, bytes_accessed=2 * n * itemsize)

    return pl.pallas_call(
        kernel,
        out_shape=jax.ShapeDtypeStruct((rows, _LANE), x2.dtype),
        grid=grid,
        in_specs=[
            pl.BlockSpec(memory_space=pltpu.MemorySpace.SMEM),  # scales
            pl.BlockSpec((bm, _LANE), lambda i: (i, 0)),        # x tile
        ],
        out_specs=pl.BlockSpec((bm, _LANE), lambda i: (i, 0)),
        compiler_params=pltpu.CompilerParams(
            dimension_semantics=("parallel",)),
        cost_estimate=cost,
        input_output_aliases=({1: 0} if donate else {}),
    )(scales.astype(jnp.float32), x2)


def quant_hardshrink(x, scales, *, lambd=0.5, bits=8, block_rows=None,
                     donate=False):
    """Pallas QuantHardShrink.

    `x` may be any shape (e.g. NCHW); `scales` is f32[2] = [scale, 1/scale].
    `donate=True` aliases the (reshaped) input buffer to the output for the
    aligned path (saves a full-size output allocation when the caller donates
    the activation).  Output matches input dtype.
    """
    # TODO(synk): qmin assumes Brevitas narrow_range=False (-2^(b-1)); use
    # -(2^(b-1) - 1) if the reference quantizer is configured narrow-range.
    qmax = float(2 ** (bits - 1) - 1)
    qmin = float(-(2 ** (bits - 1)))

    orig_shape = x.shape
    n = x.size
    flat = x.reshape(-1)
    n_main = (n // _LANE) * _LANE

    if n_main == n:
        # Common case: zero-copy reshape to a lane-dense slab.
        out = _run_slab(flat.reshape(n // _LANE, _LANE), scales,
                        lambd=lambd, qmin=qmin, qmax=qmax,
                        block_rows=block_rows, donate=donate)
        return out.reshape(orig_shape)

    if n_main == 0:
        # Entire tensor smaller than one lane row: plain jnp is cheapest.
        return _jnp_quant_hardshrink(
            flat, scales, lambd=lambd, qmin=qmin, qmax=qmax).reshape(orig_shape)

    # Ragged: kernel on the 128-aligned prefix, <128-element tail in jnp.
    # Avoids the pad + post-kernel-slice full round trips over HBM.
    out_main = _run_slab(flat[:n_main].reshape(n_main // _LANE, _LANE), scales,
                         lambd=lambd, qmin=qmin, qmax=qmax,
                         block_rows=block_rows, donate=False)
    out_tail = _jnp_quant_hardshrink(
        flat[n_main:], scales, lambd=lambd, qmin=qmin, qmax=qmax)
    return jnp.concatenate([out_main.reshape(-1), out_tail]).reshape(orig_shape)


def init_scale(x, *, lambd=0.5, bits=8, percentile=99.999):
    """Deterministic scale init mimicking percentile-based runtime scaling."""
    # TODO(synk): Brevitas' 8192-step EMA stats collection (training mode) is
    # not reproduced; the scale is derived from a single-batch percentile.
    qmax = 2 ** (bits - 1) - 1
    xf = x.astype(jnp.float32)
    y = jnp.where(jnp.abs(xf) > lambd, xf, 0.0)
    s = jnp.maximum(jnp.percentile(jnp.abs(y), percentile) / qmax, 1e-8)
    return s.astype(jnp.float32)


def _ref_quant_hardshrink(x, scales, *, lambd=0.5, bits=8):
    """Pure-JAX reference of the same forward pass."""
    qmax = float(2 ** (bits - 1) - 1)
    qmin = float(-(2 ** (bits - 1)))
    return _jnp_quant_hardshrink(x, scales, lambd=lambd, qmin=qmin, qmax=qmax)


if __name__ == "__main__":
    bits = 8
    lambd = 0.5
    key = jax.random.PRNGKey(0)
    # NCHW input, like the PyTorch module would see from a conv.
    x = jax.random.normal(key, (2, 4, 16, 16), dtype=jnp.float32)

    s = init_scale(x, lambd=lambd, bits=bits)
    scales = jnp.stack([s, 1.0 / s]).astype(jnp.float32)

    out = quant_hardshrink(x, scales, lambd=lambd, bits=bits)
    out = jax.block_until_ready(out)

    ref = _ref_quant_hardshrink(x, scales, lambd=lambd, bits=bits)
    assert out.shape == x.shape and out.dtype == x.dtype
    assert jnp.allclose(out, ref, atol=1e-6, rtol=1e-6), "mismatch vs reference"

    # Exercise the ragged (prefix + tail) path once as well.
    x_r = jax.random.normal(jax.random.PRNGKey(1), (3, 5, 7), dtype=jnp.float32)
    out_r = jax.block_until_ready(
        quant_hardshrink(x_r, scales, lambd=lambd, bits=bits))
    ref_r = _ref_quant_hardshrink(x_r, scales, lambd=lambd, bits=bits)
    assert jnp.allclose(out_r, ref_r, atol=1e-6, rtol=1e-6), "ragged mismatch"

    print("KERNEL_OK")
</pallas_src>

<mosaic_0001>
module attributes {stable_mosaic.version = 11 : i64} {
  func.func @_quant_hardshrink_kernel(%arg0: i32, %arg1: memref<2xf32, #tpu.memory_space<smem>>, %arg2: memref<16x128xf32, #tpu.memory_space<vmem>>, %arg3: memref<16x128xf32, #tpu.memory_space<vmem>>) attributes {dimension_semantics = [#tpu.dimension_semantics<parallel>], iteration_bounds = array<i64: 1>, scalar_prefetch = 0 : i64, scratch_operands = 0 : i64, tpu.core_type = #tpu.core_type<tc>, window_params = [{transform_indices = @transform_0, window_bounds = array<i64: 2>}, {transform_indices = @transform_1, window_bounds = array<i64: 16, 128>}, {transform_indices = @transform_2, window_bounds = array<i64: 16, 128>}]} {
    %c0 = arith.constant 0 : index
    %c0_0 = arith.constant 0 : index
    %0 = vector.load %arg2[%c0, %c0_0] : memref<16x128xf32, #tpu.memory_space<vmem>>, vector<16x128xf32>
    %1 = math.absf %0 : vector<16x128xf32>
    %cst = arith.constant 5.000000e-01 : f32
    %2 = vector.broadcast %cst : f32 to vector<16x128xf32>
    %3 = arith.cmpf ogt, %1, %2 : vector<16x128xf32>
    %cst_1 = arith.constant 0.000000e+00 : f32
    %4 = vector.broadcast %cst_1 : f32 to vector<16x128xf32>
    %5 = arith.select %3, %0, %4 : vector<16x128xi1>, vector<16x128xf32>
    %c1 = arith.constant 1 : index
    %6 = memref.load %arg1[%c1] : memref<2xf32, #tpu.memory_space<smem>>
    %7 = vector.broadcast %6 : f32 to vector<16x128xf32>
    %8 = arith.mulf %5, %7 : vector<16x128xf32>
    %9 = math.roundeven %8 : vector<16x128xf32>
    %cst_2 = arith.constant -1.280000e+02 : f32
    %cst_3 = arith.constant 1.270000e+02 : f32
    %10 = vector.broadcast %cst_2 : f32 to vector<16x128xf32>
    %11 = arith.maximumf %10, %9 : vector<16x128xf32>
    %12 = vector.broadcast %cst_3 : f32 to vector<16x128xf32>
    %13 = arith.minimumf %12, %11 : vector<16x128xf32>
    %c0_4 = arith.constant 0 : index
    %14 = memref.load %arg1[%c0_4] : memref<2xf32, #tpu.memory_space<smem>>
    %15 = vector.broadcast %14 : f32 to vector<16x128xf32>
    %16 = arith.mulf %13, %15 : vector<16x128xf32>
    %c0_5 = arith.constant 0 : index
    %c0_6 = arith.constant 0 : index
    %17 = vector.load %arg3[%c0_5, %c0_6] : memref<16x128xf32, #tpu.memory_space<vmem>>, vector<16x128xf32>
    tpu.vector_store %arg3[%c0_5, %c0_6], %16 {strides = array<i32>} : memref<16x128xf32, #tpu.memory_space<vmem>>, vector<16x128xf32>,
    return
  }
  func.func @transform_0(%arg0: i32) -> i32 {
    %c0_i32 = arith.constant 0 : i32
    %c0_i32_0 = arith.constant 0 : i32
    return %c0_i32 : i32
  }
  func.func @transform_1(%arg0: i32) -> (i32, i32) {
    %c0_i32 = arith.constant 0 : i32
    %c0_i32_0 = arith.constant 0 : i32
    return %arg0, %c0_i32 : i32, i32
  }
  func.func @transform_2(%arg0: i32) -> (i32, i32) {
    %c0_i32 = arith.constant 0 : i32
    %c0_i32_0 = arith.constant 0 : i32
    return %arg0, %c0_i32 : i32, i32
  }
}

</mosaic_0001>

<bundles_post_ra>
// kernel: tpu_custom_call.1
= control target key start
LH: loop header
LB: loop body
LE: loop exit
PB: predicated region body
PF: predicated region fallthrough
CT: control target
= control target key end

     0   :  { %7 = vsyncpa [#allocation5], 0  ;;  %s208_s0 = inlined_call_operand.hbm [shape: f32[2], index: 0, kind: input, shape index: {}]   ;;  %s209_s1 = inlined_call_operand.hbm [shape: f32[16,128], index: 1, kind: input, shape index: {}]   ;;  %s210_s2 = inlined_call_operand.hbm [shape: f32[16,128], index: 2, kind: output, shape index: {}]  }
   0x1   :  { %8 = vsyncpa [#allocation3], 0 }
   0x2   :  { %9 = vsyncpa [#allocation4], 0  ;;  %s15_s11 = sshll.u32 %s208_s0, 4  ;;  %s23_s14 = sshll.u32 %s209_s1, 4  ;;  %s16_s11 = int_to_ptr.hbm [resolvable:$true] %s15_s11  ;;  %s24_s14 = int_to_ptr.hbm [resolvable:$true] %s23_s14 }
   0x3   :  { %s173_s15 = smov [#allocation2]   ;;  %s174_s16 = smov [#allocation6]  }
   0x4   :  { %18 = dma.hbm_to_smem %s16_s11, 16, %s173_s15, [#allocation5]  }
   0x5   :  { %s25_s17 = sshll.u32 %s174_s16, 4  ;;  %s175_s18 = smov 128   ;;  %s26_s17 = int_to_ptr.vmem [resolvable:$true] %s25_s17 }
   0x6   :  { %s176_s19 = smov 8  }
   0x7   :  { %31 = dma.hbm_to_vmem [thread:$0]  %s24_s14, 256, %s26_s17, [#allocation3], %s175_s18, %s175_s18, %s176_s19  }
   0x8   :  { %167 = dma.done.wait [#allocation5], 16  }
   0x9   :  { %168 = vsyncadd [#allocation5], 4294967280 }
   0xa   :  { %169 = dma.done.wait [#allocation3], 256  }
   0xb   :  { %170 = vsyncadd [#allocation3], 4294967040 }
   0xc   :  { %40 = sfence }
   0xd   :  { %v41_v0 = vld [vmem:[#allocation6] sm:$0xff]  ;;  %s85_s0 = sld [smem:[#allocation2 + $0x1]]  ;;  %v42_v1 = vld [vmem:[#allocation6 + $0x8] sm:$0xff]  ;;  %s177_s20 = smov [#allocation7]  }
   0xe   :  { %v43_v2 = vand.u32 2147483647, %v41_v0  ;;  %v44_v3 = vand.u32 2147483647, %v42_v1  ;;  %s59_s1 = sld [smem:[#allocation2]]  ;;  %s69_s21 = sshll.u32 %s177_s20, 4  ;;  %s70_s21 = int_to_ptr.vmem [resolvable:$true] %s69_s21 }
   0xf   :  { %s71_s24 = sshll.u32 %s210_s2, 4  ;;  %s72_s24 = int_to_ptr.hbm [resolvable:$true] %s71_s24 }
  0x10   :  { %vm45_vm0 = vcmp.gt.f32.partialorder %v43_v2, 0.5  ;;  %vm46_vm1 = vcmp.gt.f32.partialorder %v44_v3, 0.5 }
  0x11   :  { %v47_v4 = vsel %vm45_vm0, %v41_v0, 0.0  ;;  %v48_v5 = vsel %vm46_vm1, %v42_v1, 0.0 }
  0x13   :  { %v50_v6 = vstv %s85_s0 }
  0x14   :  { %v51_v7 = vmul.f32 %v50_v6, %v47_v4  ;;  %v52_v8 = vmul.f32 %v50_v6, %v48_v5  ;;  %v60_v24 = vstv %s59_s1 }
  0x16   :  { %v88_v9 = vcvt.f32.s32 %v51_v7  ;;  %v86_v10 = vand.u32 2147483647, %v51_v7  ;;  %v96_v11 = vcvt.f32.s32 %v52_v8  ;;  %v91_v13 = vand.u32 2147483648, %v51_v7 }
  0x17   :  { %v94_v14 = vand.u32 2147483647, %v52_v8  ;;  %v99_v16 = vand.u32 2147483648, %v52_v8 }
  0x18   :  { %v89_v12 = vcvt.s32.f32 %v88_v9  ;;  %v97_v15 = vcvt.s32.f32 %v96_v11  ;;  %vm87_vm2 = vcmp.lt.f32.partialorder %v86_v10, 8388608.0 }
  0x19   :  { %vm95_vm3 = vcmp.lt.f32.partialorder %v94_v14, 8388608.0 }
  0x1a   :  { %v90_v17 = vand.u32 2147483647, %v89_v12  ;;  %v98_v18 = vand.u32 2147483647, %v97_v15 }
  0x1c   :  { %v92_v19 = vor.u32 %v91_v13, %v90_v17  ;;  %v100_v20 = vor.u32 %v99_v16, %v98_v18 }
  0x1e   :  { %v93_v21 = vsel %vm87_vm2, %v92_v19, %v51_v7  ;;  %v101_v23 = vsel %vm95_vm3, %v100_v20, %v52_v8 }
  0x1f   :  { %v55_v22 = vmax.f32 %v93_v21, -128.0  ;;  %v56_v25 = vmax.f32 %v101_v23, -128.0 }
  0x21   :  { %v57_v26 = vmin.f32 %v55_v22, 127.0  ;;  %v58_v27 = vmin.f32 %v56_v25, 127.0 }
  0x23   :  { %v61_v28 = vmul.f32 %v60_v24, %v57_v26  ;;  %v62_v29 = vmul.f32 %v60_v24, %v58_v27 }
  0x25   :  { %63 = vst [vmem:[#allocation7] sm:$0xff] %v61_v28 }
  0x26   :  { %64 = vst [vmem:[#allocation7 + $0x8] sm:$0xff] %v62_v29 }
  0x27   :  { %77 = dma.vmem_to_hbm [thread:$0]  %s70_s21, 256, %s72_s24, [#allocation4], %s175_s18, %s175_s18, %s176_s19  }
  0x28   :  { %171 = dma.done.wait [#allocation4], 256  }
  0x29   :  { %172 = vsyncadd [#allocation4], 4294967040 }
  0x2a   :  { %82 = vsyncpa [#allocation3], 1 }
  0x2b   :  { %83 = vsyncpa [#allocation4], 1 }
  0x2c   :  { %84 = vsyncpa [#allocation5], 1 }

</bundles_post_ra>
